<compile_context>
chip_gen: v6e
topology: v6e:2x2x1
jax: 0.10.0
libtpu: 0.0.40
codegen_flags: <defaults>
</compile_context>

<pallas_src>
import functools
import math

import jax
import jax.numpy as jnp
from jax.experimental import pallas as pl
from jax.experimental.pallas import tpu as pltpu


def _round_up(x, m):
    return ((x + m - 1) // m) * m


def _vmem_budget_bytes():
    """Generation-aware VMEM request with headroom (v7x 64 MiB, v5e/v6e 128 MiB)."""
    try:
        cap = int(pltpu.get_tpu_info().vmem_capacity_bytes)
    except Exception:
        cap = 64 * 1024 * 1024          # conservative fallback (safe on every gen)
    return min(int(cap * 0.75), 112 * 1024 * 1024)


def _flash_attn_kernel(q_ref, kt_ref, v_ref, o_ref, m_scr, l_scr, acc_scr,
                       *, lk_valid, block_k, mask_kv):
    """Online-softmax attention core for one (batch, q-tile, kv-tile) grid step.

    q_ref:   (Bb, H, Tq, dh)   bf16 -- queries already scaled by 1/sqrt(dh) (folded into Wq)
    kt_ref:  (Bb, H, dh, Tk)   bf16 -- K pre-transposed (lane-dense along Tk)
    v_ref:   (Bb, H, Tk, dh)   bf16
    o_ref:   (Bb, H, Tq, dh)   bf16
    scratch: m/l (Bb*H, Tq, 1) f32, acc (Bb*H, Tq, dh) f32 -- persist across kv steps.

    Correctness of the persistent scratch relies on the kv axis being the LAST,
    sequentially iterated ("arbitrary") grid axis.
    """
    kv_idx = pl.program_id(2)
    bb, nh, tq, dh = q_ref.shape
    tk = kt_ref.shape[3]

    @pl.when(kv_idx == 0)
    def _init():
        m_scr[...] = jnp.full(m_scr.shape, -jnp.inf, dtype=m_scr.dtype)
        l_scr[...] = jnp.zeros(l_scr.shape, dtype=l_scr.dtype)
        acc_scr[...] = jnp.zeros(acc_scr.shape, dtype=acc_scr.dtype)

    # Head-batched contraction: merge (batch-block, head) leading dims only
    # (last two dims untouched -> layout-preserving reshape).
    q = q_ref[...].reshape(bb * nh, tq, dh)
    kt = kt_ref[...].reshape(bb * nh, dh, tk)
    v = v_ref[...].reshape(bb * nh, tk, dh)

    # S = Q K^T as a plain MXU matmul (contracting dim already adjacent); f32 accumulate.
    s = jnp.einsum("bqd,bdk->bqk", q, kt,
                   preferred_element_type=jnp.float32)          # (Bb*H, Tq, Tk) f32

    if mask_kv:
        # Mask padded KV columns before the row max / exp so the denominator is exact.
        col = jax.lax.broadcasted_iota(jnp.int32, (1, 1, tk), 2)
        valid = (kv_idx * block_k + col) < lk_valid
        s = jnp.where(valid, s, jnp.float32(-1e30))

    # Online softmax -- all element-wise math kept in f32 (v5e has no bf16 VPU/EUP).
    m_prev = m_scr[...]
    m_new = jnp.maximum(m_prev, jnp.max(s, axis=-1, keepdims=True))
    alpha = jnp.exp(m_prev - m_new)
    p = jnp.exp(s - m_new)

    l_scr[...] = alpha * l_scr[...] + jnp.sum(p, axis=-1, keepdims=True)
    acc_scr[...] = alpha * acc_scr[...] + jnp.einsum(
        "bqk,bkd->bqd", p.astype(v.dtype), v,                   # bf16 x bf16 MXU
        preferred_element_type=jnp.float32)
    m_scr[...] = m_new

    @pl.when(kv_idx == pl.num_programs(2) - 1)
    def _finalize():
        inv_l = pl.reciprocal(l_scr[...], approx=True)           # EUP slot, ~1e-3 rel err
        out = acc_scr[...] * inv_l
        o_ref[...] = out.reshape(bb, nh, tq, dh).astype(o_ref.dtype)


def _attention_core(qh, kt, vh, *, block_b, block_q, block_k, lk_valid,
                    vmem_limit_bytes):
    """Pallas flash-attention core. qh:(B,H,Lqp,dh) kt:(B,H,dh,Lkp) vh:(B,H,Lkp,dh)."""
    B, H, lq_pad, dh = qh.shape
    lk_pad = kt.shape[3]
    num_kv = lk_pad // block_k
    grid = (B // block_b, lq_pad // block_q, num_kv)

    kernel = functools.partial(_flash_attn_kernel, lk_valid=lk_valid,
                               block_k=block_k, mask_kv=(lk_pad != lk_valid))

    # Deeper KV buffering only pays off when the DMA is exposed across several steps
    # (and it costs VMEM, which matters on v7x).
    kv_extra = {"pipeline_mode": pl.Buffered(3)} if num_kv >= 3 else {}

    in_specs = [
        pl.BlockSpec((block_b, H, block_q, dh), lambda b, qi, kv: (b, 0, qi, 0)),
        pl.BlockSpec((block_b, H, dh, block_k), lambda b, qi, kv: (b, 0, 0, kv),
                     **kv_extra),
        pl.BlockSpec((block_b, H, block_k, dh), lambda b, qi, kv: (b, 0, kv, 0),
                     **kv_extra),
    ]
    out_spec = pl.BlockSpec((block_b, H, block_q, dh), lambda b, qi, kv: (b, 0, qi, 0))

    # Advisory cost estimate so XLA overlaps the projection GEMMs with this call.
    flops = 4 * B * H * lq_pad * lk_pad * dh
    transcendentals = B * H * lq_pad * lk_pad
    bytes_accessed = (qh.size + kt.size + vh.size + B * H * lq_pad * dh) * 2
    cost = pl.CostEstimate(flops=flops, transcendentals=transcendentals,
                           bytes_accessed=bytes_accessed)

    return pl.pallas_call(
        kernel,
        out_shape=jax.ShapeDtypeStruct((B, H, lq_pad, dh), jnp.bfloat16),
        grid_spec=pltpu.PrefetchScalarGridSpec(
            num_scalar_prefetch=0,
            grid=grid,
            in_specs=in_specs,
            out_specs=out_spec,
            scratch_shapes=[
                pltpu.VMEM((block_b * H, block_q, 1), jnp.float32),   # running max m
                pltpu.VMEM((block_b * H, block_q, 1), jnp.float32),   # running denom l
                pltpu.VMEM((block_b * H, block_q, dh), jnp.float32),  # output accumulator
            ],
        ),
        compiler_params=pltpu.CompilerParams(
            dimension_semantics=("parallel", "parallel", "arbitrary"),
            vmem_limit_bytes=vmem_limit_bytes,
        ),
        cost_estimate=cost,
    )(qh, kt, vh)


def incremental_self_attention(query, key, value, params, nhead,
                               past_key=None, past_value=None,
                               block_b=None, block_q=None, block_k=None):
    """Semantics of IncrementalSelfAttention.forward.

    `params` must come from fold_scale(...): wq/bq already carry 1/sqrt(head_dim).
    Returns (attn_output, comb_key, comb_value) with the module's cache semantics
    (raw, unprojected concatenated keys/values).
    """
    if past_key is not None and past_value is not None:
        comb_key = jnp.concatenate([past_key, key], axis=1)
        comb_value = jnp.concatenate([past_value, value], axis=1)
    else:
        comb_key = key
        comb_value = value

    # TODO(synk): for real incremental decode, cache the *projected*, head-major K/V
    # (fp8/bf16) and only project+append the new tokens each step; the module's API
    # returns raw comb_key/comb_value, so the raw-cache semantics are kept here.

    wq, wk, wv, wo, bq, bk_, bv, bo = params
    B, Lq, D = query.shape
    Lk = comb_key.shape[1]
    dh = D // nhead

    # Hoisted projections: one large XLA GEMM per projection over (B*L, D), f32.
    q = query @ wq + bq            # query scale already folded into wq/bq
    k = comb_key @ wk + bk_
    v = comb_value @ wv + bv

    # Split heads in the wrapper; K pre-transposed to (B, H, dh, Lk) so the kernel's
    # QK^T is a plain MXU matmul with a lane-dense K DMA tile. Cast to bf16 for the
    # MXU and to halve K/V HBM streaming; accumulation stays f32 in-kernel.
    qh = q.reshape(B, Lq, nhead, dh).transpose(0, 2, 1, 3).astype(jnp.bfloat16)
    kt = k.reshape(B, Lk, nhead, dh).transpose(0, 2, 3, 1).astype(jnp.bfloat16)
    vh = v.reshape(B, Lk, nhead, dh).transpose(0, 2, 1, 3).astype(jnp.bfloat16)

    vmem_budget = _vmem_budget_bytes()

    # Tiling: small per-step vreg/VMEM footprint, generation-aware KV tile growth.
    if block_b is None:
        block_b = 1
    if block_q is None:
        block_q = 256 if Lq > 256 else _round_up(Lq, 8)
    lq_pad = _round_up(Lq, block_q)

    if block_k is None:
        if Lk <= 128:
            block_k = _round_up(Lk, 8)
        elif Lk <= 256:
            block_k = _round_up(Lk, 128)
        else:
            block_k = 256              # MXU-N aligned (256 on v6e/v7x; multiple of 128 for v5e)

            def _step_bytes(bk):
                kv_bytes = 2 * 3 * block_b * nhead * bk * dh * 2      # K+V, up to 3 bufs, bf16
                qo_bytes = 2 * 2 * block_b * nhead * block_q * dh * 2  # Q + out, double-buffered
                scr_bytes = block_b * nhead * block_q * (dh + 2) * 4   # f32 m/l/acc scratch
                s_spill = block_b * nhead * block_q * bk * 4           # score spill headroom
                return kv_bytes + qo_bytes + scr_bytes + s_spill

            # Grow toward 512/1024 only while it comfortably fits the VMEM budget
            # (amortizes the ~0.35us per-grid-step overhead on v5e/v6e; stays small on v7x).
            while block_k < 1024 and _step_bytes(block_k * 2) * 2 < vmem_budget:
                block_k *= 2
    lk_pad = _round_up(Lk, block_k)

    assert B % block_b == 0 and lq_pad % block_q == 0 and lk_pad % block_k == 0

    pad_q = lq_pad - Lq
    pad_k = lk_pad - Lk
    if pad_q:
        qh = jnp.pad(qh, ((0, 0), (0, 0), (0, pad_q), (0, 0)))
    if pad_k:
        kt = jnp.pad(kt, ((0, 0), (0, 0), (0, 0), (0, pad_k)))
        vh = jnp.pad(vh, ((0, 0), (0, 0), (0, pad_k), (0, 0)))

    attn_heads = _attention_core(qh, kt, vh, block_b=block_b, block_q=block_q,
                                 block_k=block_k, lk_valid=Lk,
                                 vmem_limit_bytes=vmem_budget)

    if pad_q:
        attn_heads = attn_heads[:, :, :Lq, :]
    attn = attn_heads.transpose(0, 2, 1, 3).reshape(B, Lq, D)    # bf16

    # Output projection: bf16 MXU GEMM with f32 accumulation.
    out = jnp.dot(attn, wo.astype(attn.dtype),
                  preferred_element_type=jnp.float32) + bo
    return out, comb_key, comb_value


def make_params(key, d_model):
    """Deterministic synthetic parameters (shapes from nn.MultiheadAttention).

    PyTorch stores in_proj_weight (3*D, D) and out_proj.weight (D, D); a Linear
    computes x @ W.T, so here we directly generate the already-transposed (D, D)
    matrices that `x @ W` consumes.
    """
    ks = jax.random.split(key, 8)
    std = 1.0 / math.sqrt(d_model)
    wq = jax.random.normal(ks[0], (d_model, d_model), jnp.float32) * std
    wk = jax.random.normal(ks[1], (d_model, d_model), jnp.float32) * std
    wv = jax.random.normal(ks[2], (d_model, d_model), jnp.float32) * std
    wo = jax.random.normal(ks[3], (d_model, d_model), jnp.float32) * std
    bq = jax.random.normal(ks[4], (d_model,), jnp.float32) * 0.02
    bk = jax.random.normal(ks[5], (d_model,), jnp.float32) * 0.02
    bv = jax.random.normal(ks[6], (d_model,), jnp.float32) * 0.02
    bo = jax.random.normal(ks[7], (d_model,), jnp.float32) * 0.02
    return (wq, wk, wv, wo, bq, bk, bv, bo)


def fold_scale(params, nhead):
    """One-time parameter transform: fold 1/sqrt(head_dim) into Wq / bq."""
    wq, wk, wv, wo, bq, bk, bv, bo = params
    scale = 1.0 / math.sqrt(wq.shape[0] // nhead)
    return (wq * scale, wk, wv, wo, bq * scale, bk, bv, bo)


def _reference_mha(query, comb_key, comb_value, params, nhead):
    """Pure-JAX f32 reference (mirrors torch.nn.MultiheadAttention forward math)."""
    wq, wk, wv, wo, bq, bk, bv, bo = params   # raw (unscaled) params
    q = query @ wq + bq
    k = comb_key @ wk + bk
    v = comb_value @ wv + bv
    B, Lq, D = q.shape
    Lk = k.shape[1]
    dh = D // nhead
    qh = q.reshape(B, Lq, nhead, dh).transpose(0, 2, 1, 3)
    kh = k.reshape(B, Lk, nhead, dh).transpose(0, 2, 1, 3)
    vh = v.reshape(B, Lk, nhead, dh).transpose(0, 2, 1, 3)
    s = jnp.einsum("bhqd,bhkd->bhqk", qh, kh) / math.sqrt(dh)
    p = jax.nn.softmax(s, axis=-1)
    o = jnp.einsum("bhqk,bhkd->bhqd", p, vh)
    o = o.transpose(0, 2, 1, 3).reshape(B, Lq, D)
    return o @ wo + bo


if __name__ == "__main__":
    d_model = 32
    nhead = 4
    B = 2
    Lq = 8        # query length
    Lnew = 8      # new key/value length
    Lpast = 4     # cached (past) key/value length -> Lk = 12 (exercises the KV padding mask)

    root = jax.random.PRNGKey(0)
    k_par, k_q, k_k, k_v, k_pk, k_pv = jax.random.split(root, 6)

    raw_params = make_params(k_par, d_model)
    params = fold_scale(raw_params, nhead)     # one-time weight transform

    query = jax.random.normal(k_q, (B, Lq, d_model), jnp.float32)
    key = jax.random.normal(k_k, (B, Lnew, d_model), jnp.float32)
    value = jax.random.normal(k_v, (B, Lnew, d_model), jnp.float32)
    past_key = jax.random.normal(k_pk, (B, Lpast, d_model), jnp.float32)
    past_value = jax.random.normal(k_pv, (B, Lpast, d_model), jnp.float32)

    attn_out, comb_key, comb_value = incremental_self_attention(
        query, key, value, params, nhead,
        past_key=past_key, past_value=past_value)
    jax.block_until_ready((attn_out, comb_key, comb_value))

    # Silent correctness check against a pure-JAX f32 reference. Tolerance reflects the
    # bf16 Q/K/V/attn inputs and the approx reciprocal (f32 accumulation throughout).
    ref = _reference_mha(query, comb_key, comb_value, raw_params, nhead)
    assert attn_out.shape == (B, Lq, d_model)
    assert comb_key.shape == (B, Lpast + Lnew, d_model)
    assert comb_value.shape == (B, Lpast + Lnew, d_model)
    assert jnp.allclose(attn_out, ref, atol=3e-2, rtol=3e-2)
    assert bool(jnp.all(jnp.isfinite(attn_out)))

    print("KERNEL_OK")
</pallas_src>

<mosaic_0001>
module attributes {stable_mosaic.version = 11 : i64} {
  func.func @_flash_attn_kernel(%arg0: i32, %arg1: i32, %arg2: i32, %arg3: memref<1x4x8x8xbf16, #tpu.memory_space<vmem>>, %arg4: memref<1x4x8x16xbf16, #tpu.memory_space<vmem>>, %arg5: memref<1x4x16x8xbf16, #tpu.memory_space<vmem>>, %arg6: memref<1x4x8x8xbf16, #tpu.memory_space<vmem>>, %arg7: memref<4x8x1xf32, #tpu.memory_space<vmem>>, %arg8: memref<4x8x1xf32, #tpu.memory_space<vmem>>, %arg9: memref<4x8x8xf32, #tpu.memory_space<vmem>>) attributes {dimension_semantics = [#tpu.dimension_semantics<parallel>, #tpu.dimension_semantics<parallel>, #tpu.dimension_semantics<arbitrary>], iteration_bounds = array<i64: 2, 1, 1>, scalar_prefetch = 0 : i64, scratch_operands = 3 : i64, tpu.core_type = #tpu.core_type<tc>, window_params = [{transform_indices = @transform_0, window_bounds = array<i64: 1, 4, 8, 8>}, {transform_indices = @transform_1, window_bounds = array<i64: 1, 4, 8, 16>}, {transform_indices = @transform_2, window_bounds = array<i64: 1, 4, 16, 8>}, {transform_indices = @transform_3, window_bounds = array<i64: 1, 4, 8, 8>}]} {
    %c0_i32 = arith.constant 0 : i32
    %0 = arith.cmpi eq, %arg2, %c0_i32 : i32
    %1 = arith.extui %0 : i1 to i32
    %c0_i32_0 = arith.constant 0 : i32
    %2 = arith.cmpi ne, %1, %c0_i32_0 : i32
    scf.if %2 {
      %cst_36 = arith.constant 0xFF800000 : f32
      %46 = vector.broadcast %cst_36 : f32 to vector<4x8x1xf32>
      %c0_37 = arith.constant 0 : index
      %c0_38 = arith.constant 0 : index
      %c0_39 = arith.constant 0 : index
      %47 = vector.load %arg7[%c0_37, %c0_38, %c0_39] : memref<4x8x1xf32, #tpu.memory_space<vmem>>, vector<4x8x1xf32>
      tpu.vector_store %arg7[%c0_37, %c0_38, %c0_39], %46 {strides = array<i32>} : memref<4x8x1xf32, #tpu.memory_space<vmem>>, vector<4x8x1xf32>,
      %cst_40 = arith.constant 0.000000e+00 : f32
      %48 = vector.broadcast %cst_40 : f32 to vector<4x8x1xf32>
      %c0_41 = arith.constant 0 : index
      %c0_42 = arith.constant 0 : index
      %c0_43 = arith.constant 0 : index
      %49 = vector.load %arg8[%c0_41, %c0_42, %c0_43] : memref<4x8x1xf32, #tpu.memory_space<vmem>>, vector<4x8x1xf32>
      tpu.vector_store %arg8[%c0_41, %c0_42, %c0_43], %48 {strides = array<i32>} : memref<4x8x1xf32, #tpu.memory_space<vmem>>, vector<4x8x1xf32>,
      %cst_44 = arith.constant 0.000000e+00 : f32
      %50 = vector.broadcast %cst_44 : f32 to vector<4x8x8xf32>
      %c0_45 = arith.constant 0 : index
      %c0_46 = arith.constant 0 : index
      %c0_47 = arith.constant 0 : index
      %51 = vector.load %arg9[%c0_45, %c0_46, %c0_47] : memref<4x8x8xf32, #tpu.memory_space<vmem>>, vector<4x8x8xf32>
      tpu.vector_store %arg9[%c0_45, %c0_46, %c0_47], %50 {strides = array<i32>} : memref<4x8x8xf32, #tpu.memory_space<vmem>>, vector<4x8x8xf32>,
    } else {
    }
    %c0 = arith.constant 0 : index
    %c0_1 = arith.constant 0 : index
    %c0_2 = arith.constant 0 : index
    %c0_3 = arith.constant 0 : index
    %3 = vector.load %arg3[%c0, %c0_1, %c0_2, %c0_3] : memref<1x4x8x8xbf16, #tpu.memory_space<vmem>>, vector<1x4x8x8xbf16>
    %4 = vector.shape_cast %3 : vector<1x4x8x8xbf16> to vector<4x8x8xbf16>
    %c0_4 = arith.constant 0 : index
    %c0_5 = arith.constant 0 : index
    %c0_6 = arith.constant 0 : index
    %c0_7 = arith.constant 0 : index
    %5 = vector.load %arg4[%c0_4, %c0_5, %c0_6, %c0_7] : memref<1x4x8x16xbf16, #tpu.memory_space<vmem>>, vector<1x4x8x16xbf16>
    %6 = vector.shape_cast %5 : vector<1x4x8x16xbf16> to vector<4x8x16xbf16>
    %c0_8 = arith.constant 0 : index
    %c0_9 = arith.constant 0 : index
    %c0_10 = arith.constant 0 : index
    %c0_11 = arith.constant 0 : index
    %7 = vector.load %arg5[%c0_8, %c0_9, %c0_10, %c0_11] : memref<1x4x16x8xbf16, #tpu.memory_space<vmem>>, vector<1x4x16x8xbf16>
    %8 = vector.shape_cast %7 : vector<1x4x16x8xbf16> to vector<4x16x8xbf16>
    "tpu.trace_start"() <{level = 10 : i32, message = "bqd,bdk->bqk"}> : () -> ()
    %cst = arith.constant dense<0.000000e+00> : vector<4x8x16xf32>
    %9 = tpu.matmul %4, %6, %cst {dimension_numbers = #tpu.dot_dimension_numbers<[2], [1], [1], [2], [0, 0, 0, 1, 1, 2], [0], [0]>} : vector<4x8x8xbf16>, vector<4x8x16xbf16>, vector<4x8x16xf32> -> vector<4x8x16xf32>
    "tpu.trace_stop"() : () -> ()
    %10 = tpu.iota {dimensions = array<i32: 2>} : vector<1x1x16xi32>
    %c16_i32 = arith.constant 16 : i32
    %11 = arith.muli %arg2, %c16_i32 : i32
    %12 = vector.broadcast %11 : i32 to vector<1x1x16xi32>
    %13 = arith.addi %12, %10 : vector<1x1x16xi32>
    %c12_i32 = arith.constant 12 : i32
    %14 = vector.broadcast %c12_i32 : i32 to vector<1x1x16xi32>
    %15 = arith.cmpi slt, %13, %14 : vector<1x1x16xi32>
    %cst_12 = arith.constant -1.000000e+30 : f32
    %16 = vector.shape_cast %15 : vector<1x1x16xi1> to vector<1x1x16xi1>
    %17 = vector.broadcast %16 : vector<1x1x16xi1> to vector<4x8x16xi1>
    %18 = vector.broadcast %cst_12 : f32 to vector<4x8x16xf32>
    %19 = arith.select %17, %9, %18 : vector<4x8x16xi1>, vector<4x8x16xf32>
    %c0_13 = arith.constant 0 : index
    %c0_14 = arith.constant 0 : index
    %c0_15 = arith.constant 0 : index
    %20 = vector.load %arg7[%c0_13, %c0_14, %c0_15] : memref<4x8x1xf32, #tpu.memory_space<vmem>>, vector<4x8x1xf32>
    %cst_16 = arith.constant dense<0xFF800000> : vector<4x8xf32>
    %21 = vector.multi_reduction <maximumf>, %19, %cst_16 [2] : vector<4x8x16xf32> to vector<4x8xf32>
    %22 = vector.shape_cast %21 : vector<4x8xf32> to vector<4x8x1xf32>
    %23 = arith.maximumf %20, %22 : vector<4x8x1xf32>
    %24 = arith.subf %20, %23 : vector<4x8x1xf32>
    %25 = math.exp %24 : vector<4x8x1xf32>
    %26 = vector.broadcast %23 : vector<4x8x1xf32> to vector<4x8x16xf32>
    %27 = arith.subf %19, %26 : vector<4x8x16xf32>
    %28 = math.exp %27 : vector<4x8x16xf32>
    %c0_17 = arith.constant 0 : index
    %c0_18 = arith.constant 0 : index
    %c0_19 = arith.constant 0 : index
    %29 = vector.load %arg8[%c0_17, %c0_18, %c0_19] : memref<4x8x1xf32, #tpu.memory_space<vmem>>, vector<4x8x1xf32>
    %30 = arith.mulf %25, %29 : vector<4x8x1xf32>
    %cst_20 = arith.constant dense<0.000000e+00> : vector<4x8xf32>
    %31 = vector.multi_reduction <add>, %28, %cst_20 [2] : vector<4x8x16xf32> to vector<4x8xf32>
    %32 = vector.shape_cast %31 : vector<4x8xf32> to vector<4x8x1xf32>
    %33 = arith.addf %30, %32 : vector<4x8x1xf32>
    %c0_21 = arith.constant 0 : index
    %c0_22 = arith.constant 0 : index
    %c0_23 = arith.constant 0 : index
    %34 = vector.load %arg8[%c0_21, %c0_22, %c0_23] : memref<4x8x1xf32, #tpu.memory_space<vmem>>, vector<4x8x1xf32>
    tpu.vector_store %arg8[%c0_21, %c0_22, %c0_23], %33 {strides = array<i32>} : memref<4x8x1xf32, #tpu.memory_space<vmem>>, vector<4x8x1xf32>,
    %c0_24 = arith.constant 0 : index
    %c0_25 = arith.constant 0 : index
    %c0_26 = arith.constant 0 : index
    %35 = vector.load %arg9[%c0_24, %c0_25, %c0_26] : memref<4x8x8xf32, #tpu.memory_space<vmem>>, vector<4x8x8xf32>
    %36 = vector.broadcast %25 : vector<4x8x1xf32> to vector<4x8x8xf32>
    %37 = arith.mulf %36, %35 : vector<4x8x8xf32>
    %38 = arith.truncf %28 : vector<4x8x16xf32> to vector<4x8x16xbf16>
    "tpu.trace_start"() <{level = 10 : i32, message = "bqk,bkd->bqd"}> : () -> ()
    %cst_27 = arith.constant dense<0.000000e+00> : vector<4x8x8xf32>
    %39 = tpu.matmul %38, %8, %cst_27 {dimension_numbers = #tpu.dot_dimension_numbers<[2], [1], [1], [2], [0, 0, 0, 1, 1, 2], [0], [0]>} : vector<4x8x16xbf16>, vector<4x16x8xbf16>, vector<4x8x8xf32> -> vector<4x8x8xf32>
    "tpu.trace_stop"() : () -> ()
    %40 = arith.addf %37, %39 : vector<4x8x8xf32>
    %c0_28 = arith.constant 0 : index
    %c0_29 = arith.constant 0 : index
    %c0_30 = arith.constant 0 : index
    %41 = vector.load %arg9[%c0_28, %c0_29, %c0_30] : memref<4x8x8xf32, #tpu.memory_space<vmem>>, vector<4x8x8xf32>
    tpu.vector_store %arg9[%c0_28, %c0_29, %c0_30], %40 {strides = array<i32>} : memref<4x8x8xf32, #tpu.memory_space<vmem>>, vector<4x8x8xf32>,
    %c0_31 = arith.constant 0 : index
    %c0_32 = arith.constant 0 : index
    %c0_33 = arith.constant 0 : index
    %42 = vector.load %arg7[%c0_31, %c0_32, %c0_33] : memref<4x8x1xf32, #tpu.memory_space<vmem>>, vector<4x8x1xf32>
    tpu.vector_store %arg7[%c0_31, %c0_32, %c0_33], %23 {strides = array<i32>} : memref<4x8x1xf32, #tpu.memory_space<vmem>>, vector<4x8x1xf32>,
    %c0_i32_34 = arith.constant 0 : i32
    %43 = arith.cmpi eq, %arg2, %c0_i32_34 : i32
    %44 = arith.extui %43 : i1 to i32
    %c0_i32_35 = arith.constant 0 : i32
    %45 = arith.cmpi ne, %44, %c0_i32_35 : i32
    scf.if %45 {
      %c0_36 = arith.constant 0 : index
      %c0_37 = arith.constant 0 : index
      %c0_38 = arith.constant 0 : index
      %46 = vector.load %arg8[%c0_36, %c0_37, %c0_38] : memref<4x8x1xf32, #tpu.memory_space<vmem>>, vector<4x8x1xf32>
      %47 = tpu.reciprocal %46 {approx = true} : vector<4x8x1xf32> -> vector<4x8x1xf32>
      %c0_39 = arith.constant 0 : index
      %c0_40 = arith.constant 0 : index
      %c0_41 = arith.constant 0 : index
      %48 = vector.load %arg9[%c0_39, %c0_40, %c0_41] : memref<4x8x8xf32, #tpu.memory_space<vmem>>, vector<4x8x8xf32>
      %49 = vector.broadcast %47 : vector<4x8x1xf32> to vector<4x8x8xf32>
      %50 = arith.mulf %48, %49 : vector<4x8x8xf32>
      %51 = vector.shape_cast %50 : vector<4x8x8xf32> to vector<1x4x8x8xf32>
      %52 = arith.truncf %51 : vector<1x4x8x8xf32> to vector<1x4x8x8xbf16>
      %c0_42 = arith.constant 0 : index
      %c0_43 = arith.constant 0 : index
      %c0_44 = arith.constant 0 : index
      %c0_45 = arith.constant 0 : index
      %53 = vector.load %arg6[%c0_42, %c0_43, %c0_44, %c0_45] : memref<1x4x8x8xbf16, #tpu.memory_space<vmem>>, vector<1x4x8x8xbf16>
      tpu.vector_store %arg6[%c0_42, %c0_43, %c0_44, %c0_45], %52 {strides = array<i32>} : memref<1x4x8x8xbf16, #tpu.memory_space<vmem>>, vector<1x4x8x8xbf16>,
    } else {
    }
    return
  }
  func.func @transform_0(%arg0: i32, %arg1: i32, %arg2: i32) -> (i32, i32, i32, i32) {
    %c0_i32 = arith.constant 0 : i32
    %c0_i32_0 = arith.constant 0 : i32
    %c0_i32_1 = arith.constant 0 : i32
    return %arg0, %c0_i32, %arg1, %c0_i32_0 : i32, i32, i32, i32
  }
  func.func @transform_1(%arg0: i32, %arg1: i32, %arg2: i32) -> (i32, i32, i32, i32) {
    %c0_i32 = arith.constant 0 : i32
    %c0_i32_0 = arith.constant 0 : i32
    %c0_i32_1 = arith.constant 0 : i32
    return %arg0, %c0_i32, %c0_i32_0, %arg2 : i32, i32, i32, i32
  }
  func.func @transform_2(%arg0: i32, %arg1: i32, %arg2: i32) -> (i32, i32, i32, i32) {
    %c0_i32 = arith.constant 0 : i32
    %c0_i32_0 = arith.constant 0 : i32
    %c0_i32_1 = arith.constant 0 : i32
    return %arg0, %c0_i32, %arg2, %c0_i32_0 : i32, i32, i32, i32
  }
  func.func @transform_3(%arg0: i32, %arg1: i32, %arg2: i32) -> (i32, i32, i32, i32) {
    %c0_i32 = arith.constant 0 : i32
    %c0_i32_0 = arith.constant 0 : i32
    %c0_i32_1 = arith.constant 0 : i32
    return %arg0, %c0_i32, %arg1, %c0_i32_0 : i32, i32, i32, i32
  }
}

</mosaic_0001>

<bundles_post_ra>
// kernel: tpu_custom_call.1
= control target key start
LH: loop header
LB: loop body
LE: loop exit
PB: predicated region body
PF: predicated region fallthrough
CT: control target
= control target key end

     0   :  { %8 = vsyncpa [#allocation6], 0  ;;  %s1542_s0 = inlined_call_operand.vmem [shape: bf16[2,4,8,8], index: 0, kind: input, shape index: {}]   ;;  %s1543_s1 = inlined_call_operand.vmem [shape: bf16[2,4,8,16], index: 1, kind: input, shape index: {}]   ;;  %s1544_s2 = inlined_call_operand.vmem [shape: bf16[2,4,16,8], index: 2, kind: input, shape index: {}]   ;;  %s1545_s3 = inlined_call_operand.hbm [shape: bf16[2,4,8,8], index: 3, kind: output, shape index: {}]  }
   0x1   :  { %10 = vsyncpa [#allocation6 + $0x1], 0  ;;  %s1308_s12 = smov 0   ;;  %s1310_s13 = smov 0  }
   0x2   :  { %s1312_s14 = smov 0   ;;  %s1314_s15 = smov 0  }
   0x3   :  { %s1316_s16 = smov 0   ;;  %s1318_s17 = smov 0  }
   0x4 LB: > { %s1015_s18 = sadd.s32 4294967295, %s1279_s17   ;;  %s1016_s19 = sadd.s32 4294967294, %s1279_s17   ;;  %s1279_s17 = sphi %s1318_s17, %s16_s17   ;;  %s1275_s16 = sphi %s1316_s16, %s1552_s16   ;;  %s1271_s15 = sphi %s1314_s15, %s1551_s15   ;;  %s1267_s14 = sphi %s1312_s14, %s1550_s14   ;;  %s1263_s13 = sphi %s1310_s13, %s1549_s13   ;;  %s1259_s12 = sphi %s1308_s12, %s1548_s12  }
   0x5   : > { %s35_s20 = sadd.s32 1, %s1275_s16  ;;  %s128_s21 = sadd.s32 1, %s1267_s14 }
   0x6   : > { %p37_p0 = scmp.ge.s32.totalorder %s35_s20, 2  ;;  %p138_p1 = scmp.ne.s32.totalorder %s1267_s14, %s1263_s13 }
   0x7   : > { %p139_p2 = scmp.eq.s32.totalorder %s1015_s18, 1  ;;  %p144_p3 = scmp.ne.s32.totalorder %s1263_s13, %s1259_s12 }
   0x8   : > { %s1554_s20 = smov (%p37_p0, %s35_s20), 0  ;;  %p145_p5 = scmp.eq.s32.totalorder %s1016_s19, 1 }
   0x9   : > { %p1348_p4 = por %p139_p2, %p138_p1  ;;  %s123_s23 = ssub.s32 %s1275_s16, %s1554_s20 }
   0xa   : > { %p1019_p6 = scmp.ge.s32.totalorder %s1279_s17, 1  ;;  %p126_p7 = scmp.eq.s32.totalorder %s123_s23, 0 }
   0xb   : > { %p1355_p8 = por %p145_p5, %p144_p3  ;;  %p198_p9 = scmp.lt.s32.totalorder %s1279_s17, 3 }
   0xc   : > { %s1361_s25 = scalar_select %p126_p7, %s1267_s14, %s128_s21  }
   0xd   : > { %p199_p10 = pnand %p1019_p6, %p198_p9 }
   0xe   : > { %p242_p11 = scmp.lt.s32.totalorder (!%p199_p10), %s1271_s15, 1  ;;  %s239_s11 = sand.u32 (!%p199_p10), 1, %s1263_s13  }
   0xf   : > { %202 = sbr.rel (%p199_p10) target bundleno = 823 (0x337), region = 32  ;;  %s1020_s18 = sshll.u32 (!%p199_p10), %s239_s11, 4 }
  0x10   : > { %s241_s19 = scalar_lea.vmem (!%p199_p10), [#allocation5], %s1020_s18  ;;  %s1047_s23 = sshll.u32 (!%p199_p10), %s1271_s15, 8 }
  0x11   : > { %s898_s21 = sshll.u32 (!%p199_p10), %s241_s19, 4  ;;  %s1494_s28 = scalar_lea.hbm (!%p199_p10), %s1545_s3, %s1047_s23  ;;  %s1489_s21 = int_to_ptr.vmem [resolvable:$true] %s898_s21 }
  0x12   : > { %s1497_s29 = scalar_lea.sflag (!%p199_p10), [#allocation6], %s239_s11 }
  0x14   : > { %vm282_vm0 = vcmask 64512   ;;  %v1281_v0 = vmov 0.0   ;;  %s243_s26 = scalar_select %p242_p11, %s1271_s15, 1  ;;  %vm1282_vm1 = vmmov 0   ;;  %vm307_vm2 = vcmask 1043456  }
  0x15   : > { %1064 = vmatprep.subr.bf16.mxu0 %v1281_v0  ;;  %1070 = vmatprep.subr.bf16.mxu1 %v1281_v0  ;;  %283 = vst.msk [vmem:[#allocation4] sm:$0xff] %vm282_vm0, %v1281_v0  ;;  %284 = vst.msk [vmem:[#allocation4 + $0x8] sm:$0xff] %vm282_vm0, %v1281_v0  ;;  %vm273_vm3 = vcmask 7168   ;;  %v1283_v13 = vmov -inf   ;;  %v489_v14 = vlaneseq  ;;  %vm505_vm5 = vcmask 130048   ;;  %s1203_s15 = scalar_lea.vmem %s1489_s21, 256 }
  0x16   : > { %285 = vst.msk [vmem:[#allocation4 + $0x10] sm:$0xff] %vm282_vm0, %v1281_v0  ;;  %286 = vst.msk [vmem:[#allocation4 + $0x18] sm:$0xff] %vm282_vm0, %v1281_v0  ;;  %1066 = vmatprep.mubr.msk.bf16.mxu0 %vm1282_vm1, %v1281_v0  ;;  %1072 = vmatprep.mubr.msk.bf16.mxu1 %vm1282_vm1, %v1281_v0  ;;  %s1044_s27 = sshll.u32 %s243_s26, 4  ;;  %s1046_s4 = sshll.u32 %s243_s26, 5  ;;  %v1284_v40 = vmov 0   ;;  %vm878_vm6 = vcmask 60416  }
  0x17   : > { %s257_s30 = scalar_lea.vmem %s1543_s1, %s1044_s27  ;;  %s249_s7 = scalar_lea.vmem %s1542_s0, %s1044_s27  ;;  %274 = vst.msk [vmem:[#allocation2] sm:$0xff] %vm273_vm3, %v1283_v13  ;;  %275 = vst.msk [vmem:[#allocation2 + $0x8] sm:$0xff] %vm273_vm3, %v1283_v13  ;;  %v490_v15 = vand.u32 127, %v489_v14  ;;  %1173 = vset.pattern.permute.xlu0 %v1284_v40  ;;  %1174 = vset.pattern.permute.xlu1 %v1284_v40 }
  0x18   : > { %v291_v1 = vld [vmem:[%s257_s30] sm:$0xf]  ;;  %v292_v2 = vld [vmem:[%s257_s30 + $0x4] sm:$0xf]  ;;  %v293_v3 = vld [vmem:[%s257_s30 + $0x8] sm:$0xf]  ;;  %s1390_s10 = scalar_lea.vmem %s1544_s2, %s1046_s4  ;;  %p1204_p12 = scmp.ne.s32.totalorder %s1489_s21, %s1203_s15 }
  0x19   : > { %v309_v4 = vsel %vm307_vm2, %v291_v1, 0  ;;  %v355_v5 = vsel %vm307_vm2, %v292_v2, 0  ;;  %v287_v6 = vld [vmem:[%s249_s7] sm:$0xf]  ;;  %v288_v7 = vld [vmem:[%s249_s7 + $0x4] sm:$0xf] }
  0x1a   : > { %1065 = vmatpush3.bf16.msra.mxu0 %v309_v4  ;;  %1071 = vmatpush3.bf16.msra.mxu1 %v355_v5  ;;  %v294_v8 = vld [vmem:[%s257_s30 + $0xc] sm:$0xf]  ;;  %v401_v9 = vsel %vm307_vm2, %v293_v3, 0  ;;  %v289_v11 = vld [vmem:[%s249_s7 + $0x8] sm:$0xf]  ;;  %276 = vst.msk [vmem:[#allocation2 + $0x10] sm:$0xff] %vm273_vm3, %v1283_v13  ;;  %p1205_p13 = pnand %p1204_p12, %p1348_p4 }
  0x1b   : > { %1076 = vmatprep.subr.bf16.mxu0 %v1281_v0  ;;  %1082 = vmatprep.subr.bf16.mxu1 %v1281_v0  ;;  %v447_v10 = vsel %vm307_vm2, %v294_v8, 0  ;;  %v290_v12 = vld [vmem:[%s249_s7 + $0xc] sm:$0xf]  ;;  %277 = vst.msk [vmem:[#allocation2 + $0x18] sm:$0xff] %vm273_vm3, %v1283_v13  ;;  %278 = vst.msk [vmem:[#allocation3] sm:$0xff] %vm273_vm3, %v1281_v0  ;;  %vm494_vm4 = vcmp.lt.s32.totalorder %v490_v15, 12 }
  0x1c   : > { %279 = vst.msk [vmem:[#allocation3 + $0x8] sm:$0xff] %vm273_vm3, %v1281_v0  ;;  %280 = vst.msk [vmem:[#allocation3 + $0x10] sm:$0xff] %vm273_vm3, %v1281_v0  ;;  %v1175_v56 = vld [vmem:[%s1390_s10] sm:$0xff]   ;;  %v1176_v58 = vld [vmem:[%s1390_s10 + $0x8] sm:$0xff]   ;;  %p1206_p0 = pneg %p1205_p13  ;;  %s1285_s30 = smov [#allocation5]  }
  0x1d   : > { %1067 = vmatmul.mubr.msk.bf16.vlgmr.msra.gmra.mxu0 %vm282_vm0, %v287_v6  ;;  %1073 = vmatmul.mubr.msk.bf16.vlgmr.msra.gmra.mxu1 %vm282_vm0, %v288_v7  ;;  %281 = vst.msk [vmem:[#allocation3 + $0x18] sm:$0xff] %vm273_vm3, %v1281_v0  ;;  %v1178_v13 = vld [vmem:[%s1390_s10 + $0x18] sm:$0xff]   ;;  %s1207_s4 = sshll.u32 %s1285_s30, 4  ;;  %s1208_s4 = int_to_ptr.vmem [resolvable:$false] %s1207_s4 }
  0x1e   : > { %1077 = vmatpush3.bf16.msra.mxu0 %v401_v9  ;;  %1083 = vmatpush3.bf16.msra.mxu1 %v447_v10  ;;  %v1433_v41 = vld [vmem:[#allocation2] sm:$0xff]  ;;  %v502_v44 = vld [vmem:[#allocation2 + $0x8] sm:$0xff]  ;;  %v1177_v9 = vld [vmem:[%s1390_s10 + $0x10] sm:$0xff]   ;;  %s1209_s5 = scalar_lea.vmem %s1208_s4, 512  ;;  %p1210_p1 = scmp.lt.s32.totalorder %s1489_s21, %s1208_s4 }
  0x1f   : > { %1078 = vmatprep.mubr.msk.bf16.mxu0 %vm1282_vm1, %v1281_v0  ;;  %1084 = vmatprep.mubr.msk.bf16.mxu1 %vm1282_vm1, %v1281_v0  ;;  %p1211_p2 = scmp.lt.s32.totalorder %s1209_s5, %s1203_s15 }
  0x20   : > { %1088 = vmatprep.subr.bf16.mxu0 %v1281_v0  ;;  %1094 = vmatprep.subr.bf16.mxu1 %v1281_v0 }
  0x21   : > { %v1443_v48 = vld [vmem:[#allocation2 + $0x10] sm:$0xff]  ;;  %p1212_p3 = por %p1211_p2, %p1210_p1 }
  0x22   : > { %v1447_v52 = vld [vmem:[#allocation2 + $0x18] sm:$0xff] }
  0x23   : > { %p1213_p5 = pnand %p1212_p3, %p1206_p0 }
  0x24   : > { %v569_v40 = vld [vmem:[#allocation3 + $0x18] sm:$0xff] }
  0x25   : > { %1079 = vmatmul.mubr.msk.bf16.vlgmr.msra.gmra.mxu0 %vm282_vm0, %v289_v11  ;;  %1085 = vmatmul.mubr.msk.bf16.vlgmr.msra.gmra.mxu1 %vm282_vm0, %v290_v12 }
  0x26   : > { %1090 = vmatprep.mubr.msk.bf16.mxu0 %vm1282_vm1, %v1281_v0  ;;  %1096 = vmatprep.mubr.msk.bf16.mxu1 %vm1282_vm1, %v1281_v0 }
  0x27   : > { %1089 = vmatpush3.bf16.msra.mxu0 %v1175_v56  ;;  %1095 = vmatpush3.bf16.msra.mxu1 %v1176_v58  ;;  %v596_v56 = vld [vmem:[#allocation4 + $0x8] sm:$0xff] }
  0x28   : > { %1100 = vmatprep.subr.bf16.mxu0 %v1281_v0  ;;  %1106 = vmatprep.subr.bf16.mxu1 %v1281_v0 }
  0xdd   : > { %v345_v16 = vpop.f32.mrf.mxu0  ;;  %v391_v17 = vpop.f32.mrf.mxu1 }
  0xde   : > { %v497_v18 = vsel %vm494_vm4, %v345_v16, -1e+30  ;;  %v1424_v19 = vsel %vm494_vm4, %v391_v17, -1e+30 }
  0xdf   : > { %v1068_v20 = vpop.f32.mrf.mxu0  ;;  %v1074_v21 = vpop.f32.mrf.mxu1  ;;  %v506_v22 = vsel %vm505_vm5, %v497_v18, -inf  ;;  %v509_v25 = vsel %vm505_vm5, %v1424_v19, -inf }
  0xe0   : > { %507 = vmax.xlane.f32.xlu0 %v506_v22 }
  0xe1   : > { %v348_v23 = vpop.f32.mrf.mxu0  ;;  %v394_v24 = vpop.f32.mrf.mxu1 }
  0xe3   : > { %v1069_v26 = vpop.f32.mrf.mxu0  ;;  %v1075_v27 = vpop.f32.mrf.mxu1 }
  0xe4   : > { %510 = vmax.xlane.f32.xlu0 %v509_v25 }
  0xe5   : > { %v437_v28 = vpop.f32.mrf.mxu0  ;;  %v483_v29 = vpop.f32.mrf.mxu1 }
  0xe6   : > { %v499_v30 = vsel %vm494_vm4, %v437_v28, -1e+30  ;;  %v500_v31 = vsel %vm494_vm4, %v483_v29, -1e+30  ;;  %v566_v29 = vld [vmem:[#allocation3] sm:$0xff] }
  0xe7   : > { %v1080_v32 = vpop.f32.mrf.mxu0  ;;  %v1086_v33 = vpop.f32.mrf.mxu1  ;;  %v512_v34 = vsel %vm505_vm5, %v499_v30, -inf  ;;  %v515_v37 = vsel %vm505_vm5, %v500_v31, -inf }
  0xe8   : > { %513 = vmax.xlane.f32.xlu1 %v512_v34  ;;  %v567_v32 = vld [vmem:[#allocation3 + $0x8] sm:$0xff] }
  0xe9   : > { %v440_v35 = vpop.f32.mrf.mxu0  ;;  %v486_v36 = vpop.f32.mrf.mxu1 }
  0xea   : > { %v568_v36 = vld [vmem:[#allocation3 + $0x10] sm:$0xff] }
  0xeb   : > { %v1081_v38 = vpop.f32.mrf.mxu0  ;;  %v1087_v39 = vpop.f32.mrf.mxu1 }
  0xec   : > { %516 = vmax.xlane.f32.xlu1 %v515_v37 }
 0x169   : > { %v508_v42 = vpop.xlane.xlu0 %507 }
 0x16a   : > { %v1436_v43 = vmax.f32 %v1433_v41, %v508_v42 }
 0x16c   : > { %v522_v45 = vsub.f32 %v1433_v41, %v1436_v43  ;;  %831 = vst.msk [vmem:[#allocation2] sm:$0xff] %vm273_vm3, %v1436_v43  ;;  %536 = vperm.xlu0 %1173, %v1436_v43  }
 0x16d   : > { %v511_v46 = vpop.xlane.xlu0 %510 }
 0x16e   : > { %v519_v47 = vmax.f32 %v502_v44, %v511_v46  ;;  %v526_v21 = vmul.f32 1.442695, %v522_v45 }
 0x170   : > { %v523_v49 = vsub.f32 %v502_v44, %v519_v47  ;;  %832 = vst.msk [vmem:[#allocation2 + $0x8] sm:$0xff] %vm273_vm3, %v519_v47  ;;  %541 = vperm.xlu1 %1174, %v519_v47  }
 0x171   : > { %v514_v50 = vpop.xlane.xlu1 %513 }
 0x172   : > { %v520_v51 = vmax.f32 %v1443_v48, %v514_v50 }
 0x174   : > { %v524_v53 = vsub.f32 %v1443_v48, %v520_v51  ;;  %833 = vst.msk [vmem:[#allocation2 + $0x10] sm:$0xff] %vm273_vm3, %v520_v51  ;;  %546 = vperm.xlu1 %1174, %v520_v51  }
 0x175   : > { %v517_v54 = vpop.xlane.xlu1 %516 }
 0x176   : > { %v521_v55 = vmax.f32 %v1447_v52, %v517_v54  ;;  %v595_v54 = vld [vmem:[#allocation4] sm:$0xff] }
 0x178   : > { %v525_v57 = vsub.f32 %v1447_v52, %v521_v55  ;;  %834 = vst.msk [vmem:[#allocation2 + $0x18] sm:$0xff] %vm273_vm3, %v521_v55  ;;  %551 = vperm.xlu1 %1174, %v521_v55  }
 0x17a   : > { %v532_v24 = vmul.f32 1.442695, %v525_v57 }
 0x1e7   : > { %v537_v59 = vpop.permute.xlu0 %536 }
 0x1e8   : > { %v554_v60 = vsub.f32 %v497_v18, %v537_v59 }
 0x1ea   : > { %v558_v61 = vmul.f32 1.442695, %v554_v60 }
 0x1eb   : > { %v542_v62 = vpop.permute.xlu1 %541 }
 0x1ec   : > { %1179 = vpow2.f32 %v558_v61  ;;  %v555_v63 = vsub.f32 %v1424_v19, %v542_v62  ;;  %v528_v19 = vmul.f32 1.442695, %v523_v49 }
 0x1ee   : > { %v560_v1 = vmul.f32 1.442695, %v555_v63  ;;  %v597_v63 = vld [vmem:[#allocation4 + $0x10] sm:$0xff] }
 0x1ef   : > { %v547_v2 = vpop.permute.xlu1 %546 }
 0x1f0   : > { %1181 = vpow2.f32 %v560_v1  ;;  %v556_v3 = vsub.f32 %v499_v30, %v547_v2 }
 0x1f2   : > { %v562_v4 = vmul.f32 1.442695, %v556_v3 }
 0x1f3   : > { %v552_v5 = vpop.permute.xlu1 %551 }
 0x1f4   : > { %1183 = vpow2.f32 %v562_v4  ;;  %v557_v6 = vsub.f32 %v500_v31, %v552_v5 }
 0x1f6   : > { %v564_v7 = vmul.f32 1.442695, %v557_v6 }
 0x1f8   : > { %1185 = vpow2.f32 %v564_v7 }
 0x1f9   : > { %v1180_v8 = vpop.eup %1179  ;;  %1187 = vpow2.f32 %v528_v19 }
 0x1fa   : > { %v574_v10 = vsel %vm505_vm5, %v1180_v8, 0.0  ;;  %v623_v11 = vpack.c.bf16 %v1180_v8, %v1180_v8  ;;  %1189 = vpow2.f32 %v526_v21  ;;  %v598_v8 = vld [vmem:[#allocation4 + $0x18] sm:$0xff] }
 0x1fb   : > { %575 = vadd.xlane.f32.xlu1 %v574_v10 }
 0x1fc   : > { %1091 = vmatmul.mubr.msk.bf16.vlgmr.msra.gmra.mxu0 %vm505_vm5, %v623_v11 }
 0x1fd   : > { %v1182_v12 = vpop.eup %1181  ;;  %1101 = vmatpush3.bf16.msra.mxu0 %v1177_v9  ;;  %1102 = vmatprep.mubr.msk.bf16.mxu0 %vm1282_vm1, %v1281_v0 }
 0x1fe   : > { %v577_v14 = vsel %vm505_vm5, %v1182_v12, 0.0  ;;  %v624_v15 = vpack.c.bf16 %v1182_v12, %v1182_v12 }
 0x1ff   : > { %578 = vadd.xlane.f32.xlu0 %v577_v14 }
 0x200   : > { %1097 = vmatmul.mubr.msk.bf16.vlgmr.msra.gmra.mxu1 %vm505_vm5, %v624_v15 }
 0x201   : > { %v1184_v16 = vpop.eup %1183  ;;  %1107 = vmatpush3.bf16.msra.mxu1 %v1178_v13  ;;  %1108 = vmatprep.mubr.msk.bf16.mxu1 %vm1282_vm1, %v1281_v0  ;;  %v530_v0 = vmul.f32 1.442695, %v524_v53 }
 0x202   : > { %v580_v17 = vsel %vm505_vm5, %v1184_v16, 0.0  ;;  %v625_v18 = vpack.c.bf16 %v1184_v16, %v1184_v16 }
 0x203   : > { %581 = vadd.xlane.f32.xlu1 %v580_v17  ;;  %1191 = vpow2.f32 %v530_v0 }
 0x204   : > { %1103 = vmatmul.mubr.msk.bf16.vlgmr.msra.gmra.mxu0 %vm505_vm5, %v625_v18  ;;  %1193 = vpow2.f32 %v532_v24 }
 0x205   : > { %v1186_v20 = vpop.eup %1185 }
 0x206   : > { %v583_v22 = vsel %vm505_vm5, %v1186_v20, 0.0  ;;  %v626_v23 = vpack.c.bf16 %v1186_v20, %v1186_v20  ;;  %v1188_v25 = vpop.eup %1187 }
 0x207   : > { %584 = vadd.xlane.f32.xlu1 %v583_v22  ;;  %v1190_v26 = vpop.eup %1189  ;;  %v571_v34 = vmul.f32 %v1188_v25, %v567_v32 }
 0x208   : > { %1109 = vmatmul.mubr.msk.bf16.vlgmr.msra.gmra.mxu1 %vm505_vm5, %v626_v23  ;;  %v570_v30 = vmul.f32 %v1190_v26, %v566_v29 }
 0x210   : > { %v1192_v27 = vpop.eup %1191 }
 0x211   : > { %v1194_v28 = vpop.eup %1193  ;;  %v572_v38 = vmul.f32 %v1192_v27, %v568_v36 }
 0x212   : > { %v573_v43 = vmul.f32 %v1194_v28, %v569_v40 }
 0x215   : > { %606 = vperm.xlu0 %1173, %v1188_v25  }
 0x218   : > { %601 = vperm.xlu1 %1174, %v1190_v26  }
 0x21c   : > { %611 = vperm.xlu1 %1174, %v1192_v27  }
 0x220   : > { %616 = vperm.xlu1 %1174, %v1194_v28  }
 0x284   : > { %v576_v31 = vpop.xlane.xlu1 %575 }
 0x285   : > { %v586_v33 = vadd.f32 %v576_v31, %v570_v30 }
 0x287   : > { %591 = vst.msk [vmem:[#allocation3] sm:$0xff] %vm273_vm3, %v586_v33 }
 0x288   : > { %v579_v35 = vpop.xlane.xlu0 %578 }
 0x289   : > { %v587_v37 = vadd.f32 %v579_v35, %v571_v34 }
 0x28b   : > { %592 = vst.msk [vmem:[#allocation3 + $0x8] sm:$0xff] %vm273_vm3, %v587_v37 }
 0x28c   : > { %v582_v39 = vpop.xlane.xlu1 %581 }
 0x28d   : > { %v588_v41 = vadd.f32 %v582_v39, %v572_v38 }
 0x28e   : > { %v838_v42 = vld [vmem:[#allocation3] sm:$0xff] }
 0x28f   : > { %593 = vst.msk [vmem:[#allocation3 + $0x10] sm:$0xff] %vm273_vm3, %v588_v41  ;;  %1195 = vrcp.f32 %v838_v42 }
 0x290   : > { %v585_v44 = vpop.xlane.xlu1 %584  ;;  %v607_v57 = vpop.permute.xlu0 %606 }
 0x291   : > { %v589_v45 = vadd.f32 %v585_v44, %v573_v43  ;;  %v620_v62 = vmul.f32 %v607_v57, %v596_v56 }
 0x292   : > { %v839_v46 = vld [vmem:[#allocation3 + $0x8] sm:$0xff] }
 0x293   : > { %594 = vst.msk [vmem:[#allocation3 + $0x18] sm:$0xff] %vm273_vm3, %v589_v45  ;;  %1197 = vrcp.f32 %v839_v46 }
 0x294   : > { %v602_v53 = vpop.permute.xlu1 %601 }
 0x295   : > { %v619_v55 = vmul.f32 %v602_v53, %v595_v54 }
 0x296   : > { %v840_v47 = vld [vmem:[#allocation3 + $0x10] sm:$0xff] }
 0x297   : > { %1199 = vrcp.f32 %v840_v47 }
 0x298   : > { %v612_v59 = vpop.permute.xlu1 %611 }
 0x299   : > { %v621_v6 = vmul.f32 %v612_v59, %v597_v63 }
 0x29a   : > { %v841_v48 = vld [vmem:[#allocation3 + $0x18] sm:$0xff] }
 0x29b   : > { %1201 = vrcp.f32 %v841_v48 }
 0x29c   : > { %v1196_v49 = vpop.eup %1195  ;;  %v617_v7 = vpop.permute.xlu1 %616 }
 0x29d   : > { %852 = vperm.xlu1 %1174, %v1196_v49   ;;  %v622_v14 = vmul.f32 %v617_v7, %v598_v8 }
 0x2a0   : > { %v1198_v50 = vpop.eup %1197 }
 0x2a1   : > { %857 = vperm.xlu0 %1173, %v1198_v50  }
 0x2a4   : > { %v1200_v51 = vpop.eup %1199 }
 0x2a5   : > { %862 = vperm.xlu1 %1174, %v1200_v51  }
 0x2a8   : > { %v1202_v52 = vpop.eup %1201 }
 0x2a9   : > { %867 = vperm.xlu0 %1173, %v1202_v52  }
 0x2bc   : > { %v670_v58 = vpop.f32.mrf.mxu0 }
 0x2bd   : > { %v823_v60 = vadd.f32 %v670_v58, %v619_v55 }
 0x2be   : > { %v1092_v61 = vpop.f32.mrf.mxu0 }
 0x2bf   : > { %827 = vst.msk [vmem:[#allocation4] sm:$0xff] %vm282_vm0, %v823_v60 }
 0x2c0   : > { %v673_v1 = vpop.f32.mrf.mxu0  ;;  %v719_v2 = vpop.f32.mrf.mxu1 }
 0x2c1   : > { %v824_v3 = vadd.f32 %v719_v2, %v620_v62 }
 0x2c2   : > { %v1093_v4 = vpop.f32.mrf.mxu0  ;;  %v1098_v5 = vpop.f32.mrf.mxu1 }
 0x2c3   : > { %828 = vst.msk [vmem:[#allocation4 + $0x8] sm:$0xff] %vm282_vm0, %v824_v3 }
 0x2c4   : > { %v722_v9 = vpop.f32.mrf.mxu1  ;;  %v768_v10 = vpop.f32.mrf.mxu0 }
 0x2c5   : > { %v825_v11 = vadd.f32 %v768_v10, %v621_v6 }
 0x2c6   : > { %v1099_v12 = vpop.f32.mrf.mxu1  ;;  %v1104_v13 = vpop.f32.mrf.mxu0  ;;  %v846_v23 = vld [vmem:[#allocation4] sm:$0xff] }
 0x2c7   : > { %829 = vst.msk [vmem:[#allocation4 + $0x10] sm:$0xff] %vm282_vm0, %v825_v11 }
 0x2c8   : > { %v771_v15 = vpop.f32.mrf.mxu0  ;;  %v817_v16 = vpop.f32.mrf.mxu1 }
 0x2c9   : > { %v826_v17 = vadd.f32 %v817_v16, %v622_v14 }
 0x2ca   : > { %v1105_v18 = vpop.f32.mrf.mxu0  ;;  %v1110_v19 = vpop.f32.mrf.mxu1  ;;  %v847_v25 = vld [vmem:[#allocation4 + $0x8] sm:$0xff] }
 0x2cb   : > { %830 = vst.msk [vmem:[#allocation4 + $0x18] sm:$0xff] %vm282_vm0, %v826_v17 }
 0x2cc   : > { %v820_v20 = vpop.f32.mrf.mxu1 }
 0x2ce   : > { %v1111_v21 = vpop.f32.mrf.mxu1  ;;  %v848_v30 = vld [vmem:[#allocation4 + $0x10] sm:$0xff] }
 0x2d2   : > { %v849_v34 = vld [vmem:[#allocation4 + $0x18] sm:$0xff] }
 0x318   : > { %v853_v22 = vpop.permute.xlu1 %852 }
 0x319   : > { %v870_v0 = vmul.f32 %v853_v22, %v846_v23 }
 0x31b   : > { %v874_v24 = vpack.c.bf16 %v870_v0, %v870_v0 }
 0x31c   : > { %v858_v26 = vpop.permute.xlu0 %857 }
 0x31d   : > { %879 = vst.msk [vmem:[%s241_s19] sm:$0xf] %vm878_vm6, %v874_v24  ;;  %v871_v27 = vmul.f32 %v858_v26, %v847_v25 }
 0x31f   : > { %v875_v28 = vpack.c.bf16 %v871_v27, %v871_v27 }
 0x320   : > { %v863_v29 = vpop.permute.xlu1 %862 }
 0x321   : > { %880 = vst.msk [vmem:[%s241_s19 + $0x4] sm:$0xf] %vm878_vm6, %v875_v28  ;;  %v872_v31 = vmul.f32 %v863_v29, %v848_v30 }
 0x323   : > { %v876_v32 = vpack.c.bf16 %v872_v31, %v872_v31 }
 0x324   : > { %v868_v33 = vpop.permute.xlu0 %867 }
 0x325   : > { %881 = vst.msk [vmem:[%s241_s19 + $0x8] sm:$0xf] %vm878_vm6, %v876_v32  ;;  %v873_v35 = vmul.f32 %v868_v33, %v849_v34 }
 0x327   : > { %v877_v36 = vpack.c.bf16 %v873_v35, %v873_v35 }
 0x329   : > { %882 = vst.msk [vmem:[%s241_s19 + $0xc] sm:$0xf] %vm878_vm6, %v877_v36 }
 0x32a   : > { %1216 = shalt.err (!%p1213_p5)
}
 0x32b   : > { %s1217_s6 = scalar_lea.hbm %s1494_s28, 256  ;;  %s1221_s9 = scalar_lea.hbm %s1545_s3, 512 }
 0x32c   : > { %p1218_p6 = scmp.ne.s32.totalorder %s1494_s28, %s1217_s6  ;;  %p1222_p10 = scmp.lt.s32.totalorder %s1494_s28, %s1545_s3 }
 0x32d   : > { %p1223_p11 = scmp.lt.s32.totalorder %s1221_s9, %s1217_s6 }
 0x32e   : > { %p1219_p7 = pnand %p1218_p6, %p1348_p4 }
 0x32f   : > { %p1224_p12 = por %p1223_p11, %p1222_p10 }
 0x330   : > { %p1220_p9 = pneg %p1219_p7 }
 0x332   : > { %p1225_p13 = pnand %p1224_p12, %p1220_p9 }
 0x334   : > { %1228 = shalt.err (!%p1225_p13)
}
 0x335   : > { %s1286_s18 = smov 64   ;;  %s1287_s19 = smov 4  }
 0x336   : > { %1112 = dma.vmem_to_hbm [thread:$0]  (%p1348_p4), %s1489_s21, 256, %s1494_s28, %s1497_s29, %s1286_s18, %s1286_s18, %s1287_s19  }
 0x337 PF: > { %p1118_p0 = scmp.ge.s32.totalorder %s1279_s17, 2  ;;  %s913_s23 = sand.u32 1, %s1259_s12  }
 0x338   : > { %s914_s26 = scalar_lea.sflag [#allocation6], %s913_s23 }
 0x339   : > { %p1115_p1 = pnand %p1118_p0, %p1355_p8 }
 0x33b   : > { %p1116_p2 = pneg %p1115_p1 }
 0x33d   : > { %1254 = dma.done.wait (%p1116_p2), %s914_s26, 256  }
 0x33e   : > { %1256 = vsyncadd (%p1116_p2), %s914_s26, 4294967040  ;;  %s16_s17 = sadd.s32 1, %s1279_s17   ;;  %s1548_s12 = smov %s1263_s13 }
 0x33f   : > { %p13_p3 = scmp.ge.s32.totalorder %s16_s17, 4   ;;  %s1549_s13 = smov %s1267_s14 }
 0x340   : > { %s1550_s14 = smov %s1361_s25  ;;  %s1551_s15 = smov %s1275_s16 }
 0x341   : > { %s1552_s16 = smov %s1554_s20  ;;  %15 = sbr.rel (!%p13_p3) target bundleno = 4 (0x4), region = 81 }
 0x346   :  { %919 = vsyncpa [#allocation6], 1 }
 0x347   :  { %921 = vsyncpa [#allocation6 + $0x1], 1 }

</bundles_post_ra>
